<compile_context>
chip_gen: v7x
topology: tpu7x:2x2x1
jax: 0.10.0
libtpu: 0.0.40
codegen_flags: <defaults>
</compile_context>

<pallas_src>
import functools

import jax
import jax.numpy as jnp
from jax.experimental import pallas as pl
from jax.experimental.pallas import tpu as pltpu


_TM_MAX = 512  # raised per review: re-reads W from HBM half as often vs 256


def _round_up(n: int, m: int) -> int:
    return ((n + m - 1) // m) * m


def _cdiv(a: int, b: int) -> int:
    return (a + b - 1) // b


def _vmem_budget_bytes() -> int:
    """~3/4 of physical VMEM; adapts v5e/v6e (128 MiB) vs v7x (64 MiB)."""
    try:
        cap = pltpu.get_tpu_info().vmem_capacity_bytes
    except Exception:  # pragma: no cover - conservative fallback (v7x per-TC)
        cap = 64 << 20
    return int(cap) * 3 // 4


def _pick_tile(dim_pad: int, max_tile: int) -> int:
    """Largest multiple of 128 <= max_tile dividing dim_pad, preferring
    multiples of 256 (v6e/v7x MXUs are 2x256x256)."""
    hi = min(max_tile, dim_pad)
    divisors = [c for c in range(128, hi + 1, 128) if dim_pad % c == 0]
    pref = [c for c in divisors if c % 256 == 0]
    return max(pref) if pref else max(divisors)


def _working_set(tm: int, tk: int, tn: int) -> int:
    """Double-buffered VMEM footprint estimate (bf16 x/W, f32 bias/out)."""
    return (2 * tm * tk * 2      # x tiles (bf16)
            + 2 * tk * tn * 2    # W tiles (bf16)
            + 2 * tn * 4         # bias tiles (f32)
            + 2 * tm * tn * 4)   # out tiles (f32)


def _linear_kernel(x_ref, w_ref, b_ref, o_ref):
    """One (tm, tn) f32 output tile.  The output BlockSpec is K-invariant so
    o_ref stays VMEM-resident across the K axis and doubles as the f32
    accumulator; bias is folded into the k==0 init (no finalize add)."""
    @pl.when(pl.program_id(2) == 0)
    def _():
        o_ref[...] = jnp.broadcast_to(b_ref[...], o_ref.shape).astype(o_ref.dtype)

    # bf16 x bf16 -> f32 on the MXU; accumulate directly into the f32 output.
    o_ref[...] += jnp.dot(
        x_ref[...], w_ref[...], preferred_element_type=jnp.float32
    )


@functools.partial(jax.jit, static_argnames=("n_true",))
def _pallas_linear(x, w_t, b_p, *, n_true):
    """x: (M, K) f32; w_t: (K_pad, N_pad) bf16 (pre-transposed, pre-padded);
    b_p: (1, N_pad) f32.  Returns (M, n_true) f32."""
    m, k = x.shape
    k_pad, n_pad = w_t.shape

    # ---- tile selection (trace-time; shapes are static under jit) ---------
    # tm: multiple of 16 (bf16 sublane packing) without near-doubling M pad.
    n_m_blocks = max(1, _cdiv(m, _TM_MAX))
    tm = _round_up(_cdiv(m, n_m_blocks), 16)
    m_pad = _round_up(m, tm)

    budget = _vmem_budget_bytes()
    w_bytes = 2 * k_pad * n_pad * 2  # double-buffered bf16 weight
    if w_bytes <= budget // 3 and _working_set(tm, k_pad, n_pad) <= budget:
        # Hold W fully VMEM-resident: constant index_map -> fetched once,
        # never re-streamed per M block.
        tk, tn = k_pad, n_pad
    else:
        tn = _pick_tile(n_pad, 512)
        tk = _pick_tile(k_pad, 512)

    # Megacore occupancy (v7x: 2 TensorCores shard the "parallel" axes).
    if (m_pad // tm) * (n_pad // tn) < 2 and m_pad >= 32:
        tm = _round_up(_cdiv(m_pad, 2), 16)
        m_pad = _round_up(m, tm)

    vmem_limit = int(max(min(budget, _working_set(tm, tk, tn) + (8 << 20)),
                         32 << 20))

    # ---- activation layout prep (bf16, zero-padded, lane-dense) -----------
    x_p = jnp.pad(x, ((0, m_pad - m), (0, k_pad - k))).astype(jnp.bfloat16)

    grid = (m_pad // tm, n_pad // tn, k_pad // tk)

    cost = pl.CostEstimate(
        flops=2 * m_pad * k_pad * n_pad,
        transcendentals=0,
        bytes_accessed=int(x_p.size * 2 + w_t.size * 2
                           + b_p.size * 4 + m_pad * n_pad * 4),
    )

    out_padded = pl.pallas_call(
        _linear_kernel,
        out_shape=jax.ShapeDtypeStruct((m_pad, n_pad), jnp.float32),
        grid_spec=pltpu.PrefetchScalarGridSpec(
            num_scalar_prefetch=0,
            grid=grid,
            in_specs=[
                pl.BlockSpec((tm, tk), lambda i, j, kk: (i, kk)),   # x (bf16)
                # TODO(synk): if a profile shows exposed DMA on the W stream
                # (large K, small tm), add pipeline_mode=pl.Buffered(3) here
                # and re-budget VMEM on v7x.
                pl.BlockSpec((tk, tn), lambda i, j, kk: (kk, j)),   # W^T (bf16)
                pl.BlockSpec((1, tn), lambda i, j, kk: (0, j)),     # bias (f32)
            ],
            out_specs=pl.BlockSpec((tm, tn), lambda i, j, kk: (i, j)),
        ),
        compiler_params=pltpu.CompilerParams(
            dimension_semantics=("parallel", "parallel", "arbitrary"),
            vmem_limit_bytes=vmem_limit,
        ),
        cost_estimate=cost,
    )(x_p, w_t, b_p)

    return out_padded[:m, :n_true]


class DummyMLPPallas:
    """nn.Linear forward (y = x @ W^T + b) with the weight prepared once
    (padded, transposed, bf16) so the per-call path does no weight re-layout."""

    _SMALL = 256  # below this, XLA's fused linear beats the padded Pallas path

    def __init__(self, weight, bias):
        weight = jnp.asarray(weight, jnp.float32)
        bias = jnp.asarray(bias, jnp.float32)
        if weight.ndim != 2 or bias.shape != (weight.shape[0],):
            raise ValueError("expected weight (out_dim, in_dim) and bias (out_dim,)")
        self.out_dim, self.in_dim = weight.shape
        self.weight = weight
        self.bias = bias

        k_pad = _round_up(self.in_dim, 128)
        n_pad = _round_up(self.out_dim, 128)
        # One-time prep (hoisted out of forward): pad -> transpose -> bf16.
        self.w_t = jnp.pad(
            weight, ((0, n_pad - self.out_dim), (0, k_pad - self.in_dim))
        ).T.astype(jnp.bfloat16)                                   # (K_pad, N_pad)
        self.b_p = jnp.pad(bias, (0, n_pad - self.out_dim)).reshape(1, n_pad)

    def __call__(self, x, *, force_pallas=False):
        x = jnp.asarray(x, jnp.float32)
        if x.ndim != 2 or x.shape[1] != self.in_dim:
            raise ValueError(f"expected x of shape (M, {self.in_dim}), got {x.shape}")
        small = max(x.shape[0], self.in_dim, self.out_dim) < self._SMALL
        if small and not force_pallas:
            # Tiny problem: padding 5->128 inflates DMA/flops ~25x; let XLA fuse.
            return x @ self.weight.T + self.bias
        return _pallas_linear(x, self.w_t, self.b_p, n_true=self.out_dim)


if __name__ == "__main__":
    num_features = 5
    num_graphs = 2
    num_nodes = 10
    input_dim = num_features
    output_dim = num_features

    key = jax.random.PRNGKey(0)
    kx, kw, kb, kx2, kw2, kb2 = jax.random.split(key, 6)

    # ---- spec-sized problem: (20, 5) @ (5, 5)^T + (5,) ---------------------
    x = jax.random.normal(
        kx, (num_nodes * num_graphs, num_features), dtype=jnp.float32
    )
    bound = 1.0 / jnp.sqrt(jnp.float32(input_dim))
    weight = jax.random.uniform(
        kw, (output_dim, input_dim), minval=-bound, maxval=bound, dtype=jnp.float32
    )
    bias = jax.random.uniform(
        kb, (output_dim,), minval=-bound, maxval=bound, dtype=jnp.float32
    )

    mlp = DummyMLPPallas(weight, bias)
    out = jax.block_until_ready(mlp(x, force_pallas=True))  # exercise Pallas path
    ref = x @ weight.T + bias
    assert out.shape == ref.shape
    assert jnp.allclose(out, ref, atol=2e-2, rtol=2e-2), float(
        jnp.max(jnp.abs(out - ref))
    )

    # ---- a production-class shape that takes the Pallas path by default ----
    m2, k2, n2 = 512, 512, 512
    x2 = jax.random.normal(kx2, (m2, k2), dtype=jnp.float32)
    bound2 = 1.0 / jnp.sqrt(jnp.float32(k2))
    w2 = jax.random.uniform(
        kw2, (n2, k2), minval=-bound2, maxval=bound2, dtype=jnp.float32
    )
    b2 = jax.random.uniform(
        kb2, (n2,), minval=-bound2, maxval=bound2, dtype=jnp.float32
    )
    mlp2 = DummyMLPPallas(w2, b2)
    out2 = jax.block_until_ready(mlp2(x2))
    ref2 = x2 @ w2.T + b2
    assert jnp.allclose(out2, ref2, atol=5e-2, rtol=5e-2), float(
        jnp.max(jnp.abs(out2 - ref2))
    )

    print("KERNEL_OK")
</pallas_src>

<mosaic_0001>
module attributes {stable_mosaic.version = 11 : i64} {
  func.func @_linear_kernel(%arg0: i32, %arg1: i32, %arg2: i32, %arg3: memref<16x128xbf16, #tpu.memory_space<vmem>>, %arg4: memref<128x128xbf16, #tpu.memory_space<vmem>>, %arg5: memref<1x128xf32, #tpu.memory_space<vmem>>, %arg6: memref<16x128xf32, #tpu.memory_space<vmem>>) attributes {dimension_semantics = [#tpu.dimension_semantics<parallel>, #tpu.dimension_semantics<parallel>, #tpu.dimension_semantics<arbitrary>], iteration_bounds = array<i64: 2, 1, 1>, scalar_prefetch = 0 : i64, scratch_operands = 0 : i64, tpu.core_type = #tpu.core_type<tc>, window_params = [{transform_indices = @transform_0, window_bounds = array<i64: 16, 128>}, {transform_indices = @transform_1, window_bounds = array<i64: 128, 128>}, {transform_indices = @transform_2, window_bounds = array<i64: 1, 128>}, {transform_indices = @transform_3, window_bounds = array<i64: 16, 128>}]} {
    %c0_i32 = arith.constant 0 : i32
    %0 = arith.cmpi eq, %arg2, %c0_i32 : i32
    %1 = arith.extui %0 : i1 to i32
    %c0_i32_0 = arith.constant 0 : i32
    %2 = arith.cmpi ne, %1, %c0_i32_0 : i32
    scf.if %2 {
      %c0_8 = arith.constant 0 : index
      %c0_9 = arith.constant 0 : index
      %9 = vector.load %arg5[%c0_8, %c0_9] : memref<1x128xf32, #tpu.memory_space<vmem>>, vector<1x128xf32>
      %10 = vector.shape_cast %9 : vector<1x128xf32> to vector<1x128xf32>
      %11 = vector.broadcast %10 : vector<1x128xf32> to vector<16x128xf32>
      %c0_10 = arith.constant 0 : index
      %c0_11 = arith.constant 0 : index
      %12 = vector.load %arg6[%c0_10, %c0_11] : memref<16x128xf32, #tpu.memory_space<vmem>>, vector<16x128xf32>
      tpu.vector_store %arg6[%c0_10, %c0_11], %11 {strides = array<i32>} : memref<16x128xf32, #tpu.memory_space<vmem>>, vector<16x128xf32>,
    } else {
    }
    %c0 = arith.constant 0 : index
    %c0_1 = arith.constant 0 : index
    %3 = vector.load %arg6[%c0, %c0_1] : memref<16x128xf32, #tpu.memory_space<vmem>>, vector<16x128xf32>
    %c0_2 = arith.constant 0 : index
    %c0_3 = arith.constant 0 : index
    %4 = vector.load %arg3[%c0_2, %c0_3] : memref<16x128xbf16, #tpu.memory_space<vmem>>, vector<16x128xbf16>
    %c0_4 = arith.constant 0 : index
    %c0_5 = arith.constant 0 : index
    %5 = vector.load %arg4[%c0_4, %c0_5] : memref<128x128xbf16, #tpu.memory_space<vmem>>, vector<128x128xbf16>
    %cst = arith.constant dense<0.000000e+00> : vector<16x128xf32>
    %6 = tpu.matmul %4, %5, %cst {dimension_numbers = #tpu.dot_dimension_numbers<[1], [0], [0], [1], [0, 0, 1, 1], [], []>} : vector<16x128xbf16>, vector<128x128xbf16>, vector<16x128xf32> -> vector<16x128xf32>
    %7 = arith.addf %3, %6 : vector<16x128xf32>
    %c0_6 = arith.constant 0 : index
    %c0_7 = arith.constant 0 : index
    %8 = vector.load %arg6[%c0_6, %c0_7] : memref<16x128xf32, #tpu.memory_space<vmem>>, vector<16x128xf32>
    tpu.vector_store %arg6[%c0_6, %c0_7], %7 {strides = array<i32>} : memref<16x128xf32, #tpu.memory_space<vmem>>, vector<16x128xf32>,
    return
  }
  func.func @transform_0(%arg0: i32, %arg1: i32, %arg2: i32) -> (i32, i32) {
    %c0_i32 = arith.constant 0 : i32
    return %arg0, %arg2 : i32, i32
  }
  func.func @transform_1(%arg0: i32, %arg1: i32, %arg2: i32) -> (i32, i32) {
    %c0_i32 = arith.constant 0 : i32
    return %arg2, %arg1 : i32, i32
  }
  func.func @transform_2(%arg0: i32, %arg1: i32, %arg2: i32) -> (i32, i32) {
    %c0_i32 = arith.constant 0 : i32
    %c0_i32_0 = arith.constant 0 : i32
    return %c0_i32, %arg1 : i32, i32
  }
  func.func @transform_3(%arg0: i32, %arg1: i32, %arg2: i32) -> (i32, i32) {
    %c0_i32 = arith.constant 0 : i32
    return %arg0, %arg1 : i32, i32
  }
}

</mosaic_0001>

<bundles_post_ra>
// kernel: _pallas_linear.1
= control target key start
LH: loop header
LB: loop body
LE: loop exit
PB: predicated region body
PF: predicated region fallthrough
CT: control target
= control target key end

     0   :  { %8 = vsyncpa [#allocation3], 0  ;;  %s677_s12 = smov 0   ;;  %s679_s13 = smov 0   ;;  %s755_s0 = inlined_call_operand.vmem [shape: bf16[32,128], index: 0, kind: input, shape index: {}]   ;;  %s756_s1 = inlined_call_operand.hbm [shape: bf16[128,128], index: 1, kind: input, shape index: {}]   ;;  %s757_s2 = inlined_call_operand.vmem [shape: f32[1,128], index: 2, kind: input, shape index: {}]   ;;  %s758_s3 = inlined_call_operand.vmem [shape: f32[32,128], index: 3, kind: output, shape index: {}]  }
   0x1   :  { %s681_s14 = smov 0  }
   0x2 LB: > { %s495_s15 = sadd.s32 4294967295, %s650_s14   ;;  %s33_s16 = sadd.s32 1, %s646_s13  ;;  %s650_s14 = sphi %s681_s14, %s14_s14   ;;  %s646_s13 = sphi %s679_s13, %s768_s13   ;;  %s642_s12 = sphi %s677_s12, %s767_s12  }
   0x3   : > { %p35_p0 = scmp.ge.s32.totalorder %s33_s16, 2  ;;  %p497_p1 = scmp.ge.s32.totalorder %s650_s14, 1 }
   0x4   : > { %p148_p2 = scmp.lt.s32.totalorder %s650_s14, 3  ;;  %p702_p4 = scmp.eq.s32.totalorder %s495_s15, 0 }
   0x5   : > { %s770_s16 = smov (%p35_p0, %s33_s16), 0  ;;  %s652_s19 = smov [#allocation2]  }
   0x6   : > { %p698_p3 = pnand %p497_p1, %p148_p2  ;;  %s164_s20 = sshll.u32 %s652_s19, 4  ;;  %s165_s20 = int_to_ptr.vmem [resolvable:$true] %s164_s20 }
   0x7   : > { %s763_s18 = scalar_select %p702_p4, 1, 0 }
   0x8   : > { %s762_s17 = scalar_select %p698_p3, 1, 0 }
   0x9   : > { %p552_p5 = pneg %p698_p3  ;;  %s596_s24 = scalar_lea.hbm %s756_s1, 1024 }
   0xa   : > { %p597_p7 = scmp.ne.s32.totalorder %s756_s1, %s596_s24  ;;  %p603_p11 = scmp.lt.u32.totalorder %s596_s24, %s756_s1 }
   0xb   : > { %p710_p6 = pnand %p702_p4, %p552_p5 }
   0xd   : > { %p598_p8 = pneg %p710_p6 }
   0xf   : > { %p599_p9 = pnand %p598_p8, %p597_p7 }
  0x11   : > { %p600_p10 = pneg %p599_p9 }
  0x13   : > { %p605_p12 = pnand %p603_p11, %p600_p10 }
  0x15   : > { %608 = shalt.err (!%p605_p12)
}
  0x16   : > { %s609_s29 = scalar_lea.vmem %s165_s20, 1024  ;;  %p617_p2 = scmp.lt.s32.totalorder %s165_s20, %s165_s20 }
  0x17   : > { %p610_p13 = scmp.ne.s32.totalorder %s165_s20, %s609_s29  ;;  %p618_p5 = scmp.lt.s32.totalorder %s609_s29, %s609_s29 }
  0x19   : > { %p612_p0 = pnand %p610_p13, %p598_p8  ;;  %p619_p4 = por %p618_p5, %p617_p2 }
  0x1b   : > { %p613_p1 = pneg %p612_p0 }
  0x1d   : > { %p620_p3 = pnand %p619_p4, %p613_p1 }
  0x1f   : > { %623 = shalt.err (!%p620_p3)
}
  0x20   : > { %s653_s30 = smov 64   ;;  %s654_s4 = smov 4  }
  0x21   : > { %555 = dma.hbm_to_vmem [thread:$0]  (!%p710_p6), %s756_s1, 1024, %s165_s20, [#allocation3], %s653_s30, %s653_s30, %s654_s4  }
  0x22   : > { %p765_p7 = scmp.ne.s32.totalorder %s762_s17, 0 }
  0x23   : > { %p766_p9 = scmp.ne.s32.totalorder (!%p765_p7), %s763_s18, 0 }
  0x24   : > { %198 = sbr.rel (%p765_p7) target bundleno = 294 (0x126), region = 32 }
  0x2b   : > { %637 = dma.done.wait (%p766_p9), [#allocation3], 1024  }
  0x2c   : > { %639 = vsyncadd (%p766_p9), [#allocation3], 4294966272  ;;  %s503_s7 = sshll.u32 %s642_s12, 1  ;;  %v655_v0 = vmov 0.0   ;;  %vm656_vm0 = vmmov 0   ;;  %v587_v1 = vld [vmem:[#allocation2] sm:$0xff]  }
  0x2d   : > { %528 = vmatprep.subr.bf16.mxu0 %v655_v0  ;;  %544 = vmatprep.mubr.msk.bf16.mxu0 %vm656_vm0, %v655_v0  ;;  %p232_p3 = scmp.lt.s32.totalorder %s503_s7, 3  ;;  %v588_v2 = vld [vmem:[#allocation2 + $0x8] sm:$0xff]   ;;  %v589_v3 = vld [vmem:[#allocation2 + $0x10] sm:$0xff]   ;;  %v507_v4 = vld [vmem:[%s757_s2] ss:$0 sm:$0xff] }
  0x2e   : > { %529 = vmatpush3.bf16.msra.mxu0 %v587_v1  ;;  %v590_v5 = vld [vmem:[#allocation2 + $0x18] sm:$0xff]   ;;  %v591_v6 = vld [vmem:[#allocation2 + $0x20] sm:$0xff]   ;;  %v592_v7 = vld [vmem:[#allocation2 + $0x28] sm:$0xff]  }
  0x2f   : > { %s772_s7 = smov (!%p232_p3, %s503_s7), 3  ;;  %530 = vmatprep.subr.bf16.mxu0 %v655_v0  ;;  %v593_v8 = vld [vmem:[#allocation2 + $0x30] sm:$0xff]   ;;  %v594_v9 = vld [vmem:[#allocation2 + $0x38] sm:$0xff]  }
  0x30   : > { %s504_s8 = sshll.u32 %s772_s7, 2  ;;  %s506_s9 = sshll.u32 %s772_s7, 3 }
  0x31   : > { %s238_s15 = scalar_lea.vmem %s755_s0, %s504_s8  ;;  %s251_s18 = scalar_lea.vmem %s758_s3, %s506_s9 }
  0x32   : > { %531 = vmatpush3.bf16.msra.mxu0 %v588_v2  ;;  %265 = vst [vmem:[%s251_s18] sm:$0xff] %v507_v4  ;;  %266 = vst [vmem:[%s251_s18 + $0x8] sm:$0xff] %v507_v4  ;;  %v595_v10 = vld [vmem:[%s238_s15] sm:$0xff]  }
  0x33   : > { %532 = vmatprep.subr.bf16.mxu0 %v655_v0 }
  0x36   : > { %533 = vmatpush3.bf16.msra.mxu0 %v589_v3 }
  0x37   : > { %534 = vmatprep.subr.bf16.mxu0 %v655_v0 }
  0x39   : > { %v267_v11 = vld [vmem:[%s251_s18] sm:$0xff] }
  0x3a   : > { %535 = vmatpush3.bf16.msra.mxu0 %v590_v5 }
  0x3b   : > { %536 = vmatprep.subr.bf16.mxu0 %v655_v0 }
  0x3e   : > { %537 = vmatpush3.bf16.msra.mxu0 %v591_v6 }
  0x3f   : > { %538 = vmatprep.subr.bf16.mxu0 %v655_v0 }
  0x42   : > { %539 = vmatpush3.bf16.msra.mxu0 %v592_v7 }
  0x43   : > { %540 = vmatprep.subr.bf16.mxu0 %v655_v0 }
  0x46   : > { %541 = vmatpush3.bf16.msra.mxu0 %v593_v8 }
  0x47   : > { %542 = vmatprep.subr.bf16.mxu0 %v655_v0 }
  0x4a   : > { %543 = vmatpush3.bf16.msra.mxu0 %v594_v9 }
  0x4d   : > { %545 = vmatmul.mubr.bf16.vlgmr.msra.gmra.mrb[0].mxu0 %v595_v10 }
 0x120   : > { %v375_v12 = vpop.f32.mrb[0].mxu0 }
 0x121   : > { %v382_v13 = vadd.f32 %v375_v12, %v267_v11  ;;  %v546_v14 = vpop.f32.mrb[1].mxu0 }
 0x122   : > { %v378_v15 = vpop.f32.mrb[2].mxu0 }
 0x123   : > { %v383_v16 = vadd.f32 %v507_v4, %v378_v15  ;;  %384 = vst [vmem:[%s251_s18] sm:$0xff] %v382_v13  ;;  %v547_v17 = vpop.f32.mrb[3].mxu0 }
 0x125   : > { %385 = vst [vmem:[%s251_s18 + $0x8] sm:$0xff] %v383_v16 }
 0x126 PF: > { %s14_s14 = sadd.s32 1, %s650_s14   ;;  %s767_s12 = smov %s646_s13 }
 0x127   : > { %p11_p4 = scmp.ge.s32.totalorder %s14_s14, 4   ;;  %s768_s13 = smov %s770_s16 }
 0x129   :  { %13 = sbr.rel (!%p11_p4) target bundleno = 2 (0x2), region = 75 }
 0x130   :  { %414 = vsyncpa [#allocation3], 1 }
 0x131   :  { %416 = vsyncpa [#allocation3 + $0x1], 1 }

</bundles_post_ra>
